<compile_context>
chip_gen: v7x
topology: tpu7x:2x2x1
jax: 0.10.0
libtpu: 0.0.40
codegen_flags: <defaults>
</compile_context>

<pallas_src>
import functools

import numpy as np
import jax
import jax.numpy as jnp
from jax import lax
from jax.experimental import pallas as pl
from jax.experimental.pallas import tpu as pltpu


_TK = 128  # contraction block: lane-dense for A, sublane-aligned for X


def _round_up(x, m):
    return (x + m - 1) // m * m


def _pick_tile(n, candidates):
    """Tile size minimizing padding of n; among ties prefer the largest tile that
    still yields >=2 tiles (so v7x's two TensorCores both get work)."""
    best_pad = min(_round_up(n, c) for c in candidates)
    ties = [c for c in candidates if _round_up(n, c) == best_pad]
    split = [c for c in ties if best_pad // c >= 2]
    return max(split) if split else max(ties)


def _synthesis_band_kernel(ws_ref, a_ref, x_ref, o_ref, acc_ref):
    # ws_ref : (n_out_tiles,) int32 window schedule in SMEM (used by index_maps only)
    # a_ref  : (TM, TK)  tile of the compacted band matrix
    # x_ref  : (TK, TN)  windowed slab of folded (batch*W) columns
    # o_ref  : (TM, TN)  lane-dense output tile
    k = pl.program_id(2)

    @pl.when(k == 0)
    def _():
        acc_ref[...] = jnp.zeros_like(acc_ref)

    acc_ref[...] += jnp.dot(a_ref[...], x_ref[...],
                            preferred_element_type=jnp.float32)

    @pl.when(k == pl.num_programs(2) - 1)
    def _():
        o_ref[...] = acc_ref[...].astype(o_ref.dtype)


def synthesis_forward(x, kernel_1d, M, out_size, realconv=False):
    """x: (N, 1, H_in, W) float -> (N, 1, out_size, W).  Fully jittable."""
    N, C, H_in, W = x.shape
    assert C == 1
    Kh = int(kernel_1d.shape[0])
    M = int(M)
    out_size = int(out_size)
    L = N * W

    # ---- tile sizes (minimize padding, keep (8,128) alignment) ---------------
    if out_size <= 256:
        TM = _round_up(out_size, 8)
    else:
        TM = _pick_tile(out_size, (128, 256))
    out_p = _round_up(out_size, TM)
    n_out_tiles = out_p // TM

    TN = _pick_tile(max(L, 1), (128, 256, 512, 1024))
    Lp = _round_up(L, TN)
    n_lane_tiles = Lp // TN

    # ---- static band-window schedule (pure Python ints; no device data) ------
    ws_blocks = np.zeros((n_out_tiles,), dtype=np.int32)
    nkb = 1
    for i in range(n_out_tiles):
        h0 = i * TM
        h1 = min(h0 + TM, out_size) - 1                 # last *real* output row
        lo = max(0, -((-(h0 - Kh + 1)) // M))           # ceil((h0-Kh+1)/M), clamped
        hi = min(H_in - 1, h1 // M)
        lo = min(lo, H_in - 1)
        hi = max(hi, lo)
        b_lo = lo // _TK
        b_hi = hi // _TK
        ws_blocks[i] = b_lo
        nkb = max(nkb, b_hi - b_lo + 1)
    NKb = nkb
    Kw = NKb * _TK
    Kx_p = (int(ws_blocks.max()) + NKb) * _TK           # padded input rows needed

    # ---- compacted band matrix A, built on device (jittable, no host sync) ---
    kf = jnp.asarray(kernel_1d, jnp.float32)
    kflip = kf[::-1] if realconv else kf
    ws_rows = jnp.asarray(ws_blocks * _TK)              # (n_out_tiles,) abs row start
    h = lax.broadcasted_iota(jnp.int32, (out_p, Kw), 0)
    c = lax.broadcasted_iota(jnp.int32, (out_p, Kw), 1)
    a_row = jnp.take(ws_rows, h // TM) + c              # absolute input row index
    t = h - a_row * M                                   # tap index into the filter
    valid = (t >= 0) & (t < Kh) & (a_row < H_in)
    A = jnp.where(valid, jnp.take(kflip, jnp.clip(t, 0, Kh - 1)), 0.0)

    # ---- fold batch + W into one lane-dense column axis ----------------------
    # TODO(synk): if callers can provide/consume the folded (H, N*W) layout these
    #   transpose/pad/crop copies disappear entirely.
    x2 = jnp.transpose(x[:, 0, :, :], (1, 0, 2)).reshape(H_in, L).astype(jnp.float32)
    x2 = x2[:min(H_in, Kx_p)]
    x_p = jnp.pad(x2, ((0, Kx_p - x2.shape[0]), (0, Lp - L)))

    ws_arr = jnp.asarray(ws_blocks)                     # int32 scalar-prefetch schedule

    # ---- explicit VMEM budget (double-buffered in/out + accumulator) ---------
    fp = 2 * (TM * _TK + _TK * TN) * 4 + 2 * TM * TN * 4 + TM * TN * 4
    vmem_limit = int(min(48 * 2**20, max(16 * 2**20, 4 * fp)))

    grid = (n_out_tiles, n_lane_tiles, NKb)

    y_p = pl.pallas_call(
        _synthesis_band_kernel,
        out_shape=jax.ShapeDtypeStruct((out_p, Lp), jnp.float32),
        grid_spec=pltpu.PrefetchScalarGridSpec(
            num_scalar_prefetch=1,
            grid=grid,
            in_specs=[
                pl.BlockSpec((TM, _TK), lambda i, j, k, ws: (i, k)),          # band of A
                pl.BlockSpec((_TK, TN), lambda i, j, k, ws: (ws[i] + k, j)),  # X window
            ],
            out_specs=pl.BlockSpec((TM, TN), lambda i, j, k, ws: (i, j)),
            scratch_shapes=[pltpu.VMEM((TM, TN), jnp.float32)],
        ),
        compiler_params=pltpu.CompilerParams(
            dimension_semantics=("parallel", "parallel", "arbitrary"),
            vmem_limit_bytes=vmem_limit),
    )(ws_arr, A, x_p)

    # ---- crop padding and unfold back to (N, 1, out_size, W) ------------------
    y = y_p[:out_size, :L].reshape(out_size, N, W)
    return jnp.transpose(y, (1, 0, 2))[:, None, :, :].astype(x.dtype)


def _reference_synthesis(x, kernel_1d, M, out_size, realconv=False):
    """Pure-numpy conv_transpose2d(in=1, out=1, stride=(M,1)) + crop reference."""
    k = np.asarray(kernel_1d)[::-1] if realconv else np.asarray(kernel_1d)
    x = np.asarray(x)
    N, C, H, W = x.shape
    Kh = k.shape[0]
    Hf = (H - 1) * M + Kh
    out = np.zeros((N, 1, max(Hf, out_size), W), dtype=np.float32)
    for i in range(H):
        out[:, :, i * M: i * M + Kh, :] += (
            x[:, :, i: i + 1, :] * k[None, None, :, None]
        )
    return out[:, :, :out_size, :]


if __name__ == "__main__":
    key = jax.random.PRNGKey(0)
    k_kern, k_x, k_kern2, k_x2 = jax.random.split(key, 4)

    # ---- test 1: module-sized toy config (M=2, length-8 filter) --------------
    M = 2
    Kh = 8
    kernel_1d = jax.random.normal(k_kern, (Kh,), dtype=jnp.float32)
    N, H_in, W = 2, 16, 8
    x = jax.random.normal(k_x, (N, 1, H_in, W), dtype=jnp.float32)
    out_size = H_in * M  # 32
    realconv = False

    fwd = jax.jit(functools.partial(synthesis_forward, M=M, out_size=out_size,
                                    realconv=realconv))
    y = jax.block_until_ready(fwd(x, kernel_1d))
    y_ref = _reference_synthesis(np.asarray(x), np.asarray(kernel_1d), M,
                                 out_size, realconv=realconv)
    assert y.shape == (N, 1, out_size, W), y.shape
    np.testing.assert_allclose(np.asarray(y), y_ref, rtol=1e-5, atol=1e-5)

    # ---- test 2: larger H_in / M=3 / realconv=True exercises multi-tile band,
    #      multi-block K windows and the kernel-flip path ----------------------
    M2, Kh2 = 3, 12
    kernel2 = jax.random.normal(k_kern2, (Kh2,), dtype=jnp.float32)
    N2, H2, W2 = 2, 300, 8
    x2 = jax.random.normal(k_x2, (N2, 1, H2, W2), dtype=jnp.float32)
    out2 = H2 * M2  # 900
    fwd2 = jax.jit(functools.partial(synthesis_forward, M=M2, out_size=out2,
                                     realconv=True))
    y2 = jax.block_until_ready(fwd2(x2, kernel2))
    y2_ref = _reference_synthesis(np.asarray(x2), np.asarray(kernel2), M2,
                                  out2, realconv=True)
    assert y2.shape == (N2, 1, out2, W2), y2.shape
    np.testing.assert_allclose(np.asarray(y2), y2_ref, rtol=1e-4, atol=1e-4)

    print("KERNEL_OK")
</pallas_src>

<mosaic_0001>
module attributes {stable_mosaic.version = 11 : i64} {
  func.func @_synthesis_band_kernel(%arg0: i32, %arg1: i32, %arg2: i32, %arg3: memref<1xi32, #tpu.memory_space<smem>>, %arg4: memref<32x128xf32, #tpu.memory_space<vmem>>, %arg5: memref<128x128xf32, #tpu.memory_space<vmem>>, %arg6: memref<32x128xf32, #tpu.memory_space<vmem>>, %arg7: memref<32x128xf32, #tpu.memory_space<vmem>>) attributes {dimension_semantics = [#tpu.dimension_semantics<parallel>, #tpu.dimension_semantics<parallel>, #tpu.dimension_semantics<arbitrary>], iteration_bounds = array<i64: 1, 1, 1>, scalar_prefetch = 1 : i64, scratch_operands = 1 : i64, tpu.core_type = #tpu.core_type<tc>, window_params = [{transform_indices = @transform_0, window_bounds = array<i64: 32, 128>}, {transform_indices = @transform_1, window_bounds = array<i64: 128, 128>}, {transform_indices = @transform_2, window_bounds = array<i64: 32, 128>}]} {
    %c0_i32 = arith.constant 0 : i32
    %0 = arith.cmpi eq, %arg2, %c0_i32 : i32
    %1 = arith.extui %0 : i1 to i32
    %c0_i32_0 = arith.constant 0 : i32
    %2 = arith.cmpi ne, %1, %c0_i32_0 : i32
    scf.if %2 {
      %cst_10 = arith.constant 0.000000e+00 : f32
      %12 = vector.broadcast %cst_10 : f32 to vector<32x128xf32>
      %c0_11 = arith.constant 0 : index
      %c0_12 = arith.constant 0 : index
      %13 = vector.load %arg7[%c0_11, %c0_12] : memref<32x128xf32, #tpu.memory_space<vmem>>, vector<32x128xf32>
      tpu.vector_store %arg7[%c0_11, %c0_12], %12 {strides = array<i32>} : memref<32x128xf32, #tpu.memory_space<vmem>>, vector<32x128xf32>,
    } else {
    }
    %c0 = arith.constant 0 : index
    %c0_1 = arith.constant 0 : index
    %3 = vector.load %arg7[%c0, %c0_1] : memref<32x128xf32, #tpu.memory_space<vmem>>, vector<32x128xf32>
    %c0_2 = arith.constant 0 : index
    %c0_3 = arith.constant 0 : index
    %4 = vector.load %arg4[%c0_2, %c0_3] : memref<32x128xf32, #tpu.memory_space<vmem>>, vector<32x128xf32>
    %c0_4 = arith.constant 0 : index
    %c0_5 = arith.constant 0 : index
    %5 = vector.load %arg5[%c0_4, %c0_5] : memref<128x128xf32, #tpu.memory_space<vmem>>, vector<128x128xf32>
    %cst = arith.constant dense<0.000000e+00> : vector<32x128xf32>
    %6 = tpu.matmul %4, %5, %cst {dimension_numbers = #tpu.dot_dimension_numbers<[1], [0], [0], [1], [0, 0, 1, 1], [], []>} : vector<32x128xf32>, vector<128x128xf32>, vector<32x128xf32> -> vector<32x128xf32>
    %7 = arith.addf %3, %6 : vector<32x128xf32>
    %c0_6 = arith.constant 0 : index
    %c0_7 = arith.constant 0 : index
    %8 = vector.load %arg7[%c0_6, %c0_7] : memref<32x128xf32, #tpu.memory_space<vmem>>, vector<32x128xf32>
    tpu.vector_store %arg7[%c0_6, %c0_7], %7 {strides = array<i32>} : memref<32x128xf32, #tpu.memory_space<vmem>>, vector<32x128xf32>,
    %c0_i32_8 = arith.constant 0 : i32
    %9 = arith.cmpi eq, %arg2, %c0_i32_8 : i32
    %10 = arith.extui %9 : i1 to i32
    %c0_i32_9 = arith.constant 0 : i32
    %11 = arith.cmpi ne, %10, %c0_i32_9 : i32
    scf.if %11 {
      %c0_10 = arith.constant 0 : index
      %c0_11 = arith.constant 0 : index
      %12 = vector.load %arg7[%c0_10, %c0_11] : memref<32x128xf32, #tpu.memory_space<vmem>>, vector<32x128xf32>
      %c0_12 = arith.constant 0 : index
      %c0_13 = arith.constant 0 : index
      %13 = vector.load %arg6[%c0_12, %c0_13] : memref<32x128xf32, #tpu.memory_space<vmem>>, vector<32x128xf32>
      tpu.vector_store %arg6[%c0_12, %c0_13], %12 {strides = array<i32>} : memref<32x128xf32, #tpu.memory_space<vmem>>, vector<32x128xf32>,
    } else {
    }
    return
  }
  func.func @transform_0(%arg0: i32, %arg1: i32, %arg2: i32, %arg3: memref<1xi32, #tpu.memory_space<smem>>) -> (i32, i32) {
    %c0_i32 = arith.constant 0 : i32
    return %arg0, %arg2 : i32, i32
  }
  func.func @transform_1(%arg0: i32, %arg1: i32, %arg2: i32, %arg3: memref<1xi32, #tpu.memory_space<smem>>) -> (i32, i32) {
    %0 = arith.index_cast %arg0 : i32 to index
    %1 = memref.load %arg3[%0] : memref<1xi32, #tpu.memory_space<smem>>
    %2 = arith.addi %1, %arg2 : i32
    %c0_i32 = arith.constant 0 : i32
    return %2, %arg1 : i32, i32
  }
  func.func @transform_2(%arg0: i32, %arg1: i32, %arg2: i32, %arg3: memref<1xi32, #tpu.memory_space<smem>>) -> (i32, i32) {
    %c0_i32 = arith.constant 0 : i32
    return %arg0, %arg1 : i32, i32
  }
}

</mosaic_0001>

<bundles_post_ra>
// kernel: synthesis_forward.1
= control target key start
LH: loop header
LB: loop body
LE: loop exit
PB: predicated region body
PF: predicated region fallthrough
CT: control target
= control target key end

     0   :  { %s362_s0 = inlined_call_operand.<no memory space> [shape: s32[1], index: 0, kind: input, shape index: {}]   ;;  %s363_s1 = inlined_call_operand.vmem [shape: f32[32,128], index: 1, kind: input, shape index: {}]   ;;  %s364_s2 = inlined_call_operand.vmem [shape: f32[128,128], index: 2, kind: input, shape index: {}]   ;;  %s365_s3 = inlined_call_operand.vmem [shape: f32[32,128], index: 3, kind: output, shape index: {}]  }
   0x1   :  { %s186_s14 = sshll.u32 %s362_s0, 4  ;;  %v52_v0 = vld [vmem:[%s363_s1] sm:$0xff]  ;;  %v54_v1 = vld [vmem:[%s363_s1 + $0x10] sm:$0xff]  ;;  %v53_v26 = vld [vmem:[%s363_s1 + $0x8] sm:$0xff] }
   0x2   :  { %p33_p0 = scmp.lt.s32.totalorder %s186_s14, 15  ;;  %240 = vmatprep.mubr.f32.mxu0 %v52_v0  ;;  %243 = vmatprep.mubr.f32.mxu1 %v54_v1  ;;  %v55_v27 = vld [vmem:[%s363_s1 + $0x18] sm:$0xff] }
   0x4   :  { %s367_s14 = smov (!%p33_p0, %s186_s14), 15 }
   0x5   :  { %s187_s19 = sshll.u32 %s367_s14, 3 }
   0x6   :  { %s326_s22 = scalar_lea.vmem %s364_s2, %s187_s19 }
   0x7   :  { %v56_v2 = vld [vmem:[%s326_s22] sm:$0xff]  ;;  %v57_v3 = vld [vmem:[%s326_s22 + $0x8] sm:$0xff]  ;;  %v58_v4 = vld [vmem:[%s326_s22 + $0x10] sm:$0xff] }
   0x8   :  { %v246_v5 = vpack.c.bf16 %v57_v3, %v56_v2  ;;  %v59_v6 = vld [vmem:[%s326_s22 + $0x18] sm:$0xff]  ;;  %v60_v8 = vld [vmem:[%s326_s22 + $0x20] sm:$0xff]  ;;  %v61_v9 = vld [vmem:[%s326_s22 + $0x28] sm:$0xff] }
   0x9   :  { %v250_v7 = vpack.c.bf16 %v59_v6, %v58_v4  ;;  %v254_v10 = vpack.c.bf16 %v61_v9, %v60_v8  ;;  %v62_v11 = vld [vmem:[%s326_s22 + $0x30] sm:$0xff]  ;;  %v63_v12 = vld [vmem:[%s326_s22 + $0x38] sm:$0xff]  ;;  %v64_v14 = vld [vmem:[%s326_s22 + $0x40] sm:$0xff] }
   0xa   :  { %247 = vmatprep.subr.bf16.mxu0 %v246_v5  ;;  %278 = vmatprep.subr.bf16.mxu1 %v246_v5  ;;  %v258_v13 = vpack.c.bf16 %v63_v12, %v62_v11  ;;  %v65_v15 = vld [vmem:[%s326_s22 + $0x48] sm:$0xff]  ;;  %v66_v17 = vld [vmem:[%s326_s22 + $0x50] sm:$0xff]  ;;  %v67_v18 = vld [vmem:[%s326_s22 + $0x58] sm:$0xff] }
   0xb   :  { %249 = vmatpush3.bf16.msra.mxu0 %v246_v5  ;;  %286 = vmatpush3.bf16.msra.mxu1 %v246_v5  ;;  %v262_v16 = vpack.c.bf16 %v65_v15, %v64_v14  ;;  %v266_v19 = vpack.c.bf16 %v67_v18, %v66_v17  ;;  %v68_v20 = vld [vmem:[%s326_s22 + $0x60] sm:$0xff]  ;;  %v69_v21 = vld [vmem:[%s326_s22 + $0x68] sm:$0xff]  ;;  %v70_v23 = vld [vmem:[%s326_s22 + $0x70] sm:$0xff] }
   0xc   :  { %251 = vmatprep.subr.bf16.mxu0 %v250_v7  ;;  %279 = vmatprep.subr.bf16.mxu1 %v250_v7  ;;  %v270_v22 = vpack.c.bf16 %v69_v21, %v68_v20  ;;  %v71_v24 = vld [vmem:[%s326_s22 + $0x78] sm:$0xff] }
   0xd   :  { %v274_v25 = vpack.c.bf16 %v71_v24, %v70_v23 }
   0xf   :  { %253 = vmatpush3.bf16.msra.mxu0 %v250_v7  ;;  %287 = vmatpush3.bf16.msra.mxu1 %v250_v7 }
  0x10   :  { %255 = vmatprep.subr.bf16.mxu0 %v254_v10  ;;  %280 = vmatprep.subr.bf16.mxu1 %v254_v10 }
  0x13   :  { %257 = vmatpush3.bf16.msra.mxu0 %v254_v10  ;;  %288 = vmatpush3.bf16.msra.mxu1 %v254_v10 }
  0x14   :  { %259 = vmatprep.subr.bf16.mxu0 %v258_v13  ;;  %281 = vmatprep.subr.bf16.mxu1 %v258_v13 }
  0x17   :  { %261 = vmatpush3.bf16.msra.mxu0 %v258_v13  ;;  %289 = vmatpush3.bf16.msra.mxu1 %v258_v13 }
  0x18   :  { %263 = vmatprep.subr.bf16.mxu0 %v262_v16  ;;  %282 = vmatprep.subr.bf16.mxu1 %v262_v16 }
  0x1b   :  { %265 = vmatpush3.bf16.msra.mxu0 %v262_v16  ;;  %290 = vmatpush3.bf16.msra.mxu1 %v262_v16 }
  0x1c   :  { %267 = vmatprep.subr.bf16.mxu0 %v266_v19  ;;  %283 = vmatprep.subr.bf16.mxu1 %v266_v19 }
  0x1f   :  { %269 = vmatpush3.bf16.msra.mxu0 %v266_v19  ;;  %291 = vmatpush3.bf16.msra.mxu1 %v266_v19 }
  0x20   :  { %271 = vmatprep.subr.bf16.mxu0 %v270_v22  ;;  %284 = vmatprep.subr.bf16.mxu1 %v270_v22 }
  0x23   :  { %273 = vmatpush3.bf16.msra.mxu0 %v270_v22  ;;  %292 = vmatpush3.bf16.msra.mxu1 %v270_v22 }
  0x24   :  { %275 = vmatprep.subr.bf16.mxu0 %v274_v25  ;;  %285 = vmatprep.subr.bf16.mxu1 %v274_v25 }
  0x27   :  { %277 = vmatpush3.bf16.msra.mxu0 %v274_v25  ;;  %293 = vmatpush3.bf16.msra.mxu1 %v274_v25 }
  0x2a   :  { %241 = vmatmul.mubr.f32.vlgmr.msra.gmra.mrb[0].mxu0 %v53_v26  ;;  %244 = vmatmul.mubr.f32.vlgmr.msra.gmra.mrb[0].mxu1 %v55_v27 }
  0xfd   :  { %v242_v28 = vpop.f32.mrb[0].mxu0  ;;  %v245_v29 = vpop.f32.mrb[0].mxu1 }
  0xfe   :  { %173 = vst [vmem:[%s365_s3 + $0x8] sm:$0xff] %v242_v28  ;;  %175 = vst [vmem:[%s365_s3 + $0x18] sm:$0xff] %v245_v29  ;;  %v138_v30 = vpop.f32.mrb[1].mxu0  ;;  %v148_v31 = vpop.f32.mrb[1].mxu1 }
  0xff   :  { %172 = vst [vmem:[%s365_s3] sm:$0xff] %v138_v30  ;;  %174 = vst [vmem:[%s365_s3 + $0x10] sm:$0xff] %v148_v31 }

</bundles_post_ra>
